<compile_context>
chip_gen: v6e
topology: v6e:2x2x1
jax: 0.10.0
libtpu: 0.0.40
codegen_flags: <defaults>
</compile_context>

<pallas_src>
import math

import jax
import jax.numpy as jnp
from jax import lax
from jax.experimental import pallas as pl
from jax.experimental.pallas import tpu as pltpu

LN_EPS = 1e-5


def _patch_merge_kernel(x_ref, wa_ref, wb_ref, p_ref, o_ref):
    # x_ref : (TR, 2, Wh, 2C)  merged-parity tile; axis 1: 0 = even rows, 1 = odd rows
    #         lane axis packs [col-even C feats | col-odd C feats]
    # wa_ref: (2C, 2C) reduction-weight rows for [x0; x2]
    # wb_ref: (2C, 2C) reduction-weight rows for [x1; x3]
    # p_ref : (2, 2C)  row 0 = LayerNorm gamma, row 1 = beta (f32)
    # o_ref : (TR*Wh, 2C)
    two_c = o_ref.shape[-1]

    x = x_ref[...]                                  # one contiguous tile load
    # Parity slices are leading-axis vreg selections (no data movement); the
    # (TR, Wh, 2C) -> (TR*Wh, 2C) flatten is layout-free when Wh % 8 == 0.
    xa = x[:, 0, :, :].reshape(-1, two_c)           # even rows: [x0 | x2]
    xb = x[:, 1, :, :].reshape(-1, two_c)           # odd rows:  [x1 | x3]

    # Fused gather-matmul: y = [x0|x2] @ wa + [x1|x3] @ wb == [x0 x1 x2 x3] @ W.
    # Operands stay in the activation dtype; accumulation is f32 on the MXU.
    y = jnp.dot(xa, wa_ref[...], preferred_element_type=jnp.float32)
    y = y + jnp.dot(xb, wb_ref[...], preferred_element_type=jnp.float32)

    # LayerNorm over the 2C lane axis (centered two-pass variance, f32 math).
    inv_n = jnp.float32(1.0 / two_c)
    mean = jnp.sum(y, axis=-1, keepdims=True) * inv_n
    yc = y - mean
    var = jnp.sum(yc * yc, axis=-1, keepdims=True) * inv_n
    y_norm = yc * lax.rsqrt(var + jnp.float32(LN_EPS))

    params = p_ref[...].astype(jnp.float32)
    gamma = params[0:1, :]
    beta = params[1:2, :]
    o_ref[...] = (y_norm * gamma + beta).astype(o_ref.dtype)


def _vmem_limit_bytes():
    """Per-generation VMEM budget: ~3/4 of physical per-core VMEM, capped at
    96 MiB (v5e/v6e: 128 MiB physical -> 96 MiB; v7x: 64 MiB -> 48 MiB)."""
    try:
        cap = int(pltpu.get_tpu_info().vmem_capacity_bytes)
    except Exception:
        cap = 64 * 1024 * 1024          # conservative fallback (v7x per-TC VMEM)
    return int(min((cap * 3) // 4, 96 * 1024 * 1024))


def _choose_row_tile(R, Wh, two_c, itemsize, vmem_budget):
    """Largest TR (merged rows per grid step) such that:
      * double-buffered in/out blocks + f32 temps + 2x resident weights fit
        the VMEM budget,
      * the output block row count TR*Wh is sublane aligned (% 8 == 0), and
      * the grid keeps >= 4 steps when R allows (2 per TensorCore on v7x,
        and enough steps for DMA/compute overlap everywhere)."""
    def tile_bytes(tr):
        tok = tr * Wh
        in_b = tr * 2 * Wh * two_c * itemsize       # merged-parity input block
        out_b = tok * two_c * itemsize              # output block
        f32_tmp = 3 * tok * two_c * 4               # y / centered / normalized
        return 2 * in_b + 2 * out_b + f32_tmp       # blocks are double-buffered

    weights_bytes = 2 * (2 * two_c * two_c * itemsize) + 2 * (2 * two_c * 4)
    budget = max(tile_bytes(1), vmem_budget - weights_bytes)
    cap_vmem = max(1, budget // tile_bytes(1))
    cap_grid = max(1, -(-R // 4))                   # aim for >= 4 grid steps
    cap = int(max(1, min(R, cap_vmem, cap_grid)))

    step = 8 // math.gcd(Wh, 8)                     # (step*Wh) % 8 == 0
    if R < step:
        return R                                    # tm == M (full extent) is legal
    cap = max(step, (cap // step) * step)           # largest aligned TR <= cap
    for tr in range(cap, step - 1, -step):          # prefer TR dividing R (no tail)
        if R % tr == 0:
            return tr
    return cap                                      # aligned; masked tail block


def patch_merging_forward(x, w_reduction, ln_gamma, ln_beta, input_resolution):
    """x: (B, H*W, C) -> (B, (H/2)*(W/2), 2*C).  Matches PyTorch PatchMerging."""
    H, W = input_resolution
    B, L, C = x.shape
    assert L == H * W, "input feature has wrong size"
    assert H % 2 == 0 and W % 2 == 0, f"x size ({H}*{W}) are not even."

    Hh, Wh = H // 2, W // 2
    R = B * Hh                 # merged-row count
    M = R * Wh                 # output tokens
    two_c = 2 * C
    four_c = 4 * C

    # Free contiguous reshape: (B, H*W, C) == (B, H/2, 2, W/2, 2, C)
    #   -> (R, 2, Wh, 2C).  Axis 1 is the row parity; the 2C lane axis holds
    #   [col-parity-0 C feats | col-parity-1 C feats].
    xr = x.reshape(R, 2, Wh, two_c)

    # One-time reorder of the (4C, 2C) reduction weight so the fused gather
    # needs only two (2C, 2C) matmuls, cast to the activation dtype so the
    # MXU runs in the native (e.g. bf16) rate; accumulation stays f32.
    assert w_reduction.shape == (four_c, two_c)
    w = w_reduction.astype(x.dtype)
    wa = jnp.concatenate([w[0:C], w[2 * C:3 * C]], axis=0)   # rows for [x0; x2]
    wb = jnp.concatenate([w[C:2 * C], w[3 * C:4 * C]], axis=0)  # rows for [x1; x3]

    # gamma/beta fused into one small resident f32 block.
    params = jnp.stack([ln_gamma, ln_beta], axis=0).astype(jnp.float32)  # (2, 2C)

    itemsize = jnp.dtype(x.dtype).itemsize
    vmem_limit = _vmem_limit_bytes()
    TR = _choose_row_tile(R, Wh, two_c, itemsize, vmem_limit)
    tm = TR * Wh                                     # output tokens per tile
    grid = (pl.cdiv(R, TR),)

    out = pl.pallas_call(
        _patch_merge_kernel,
        out_shape=jax.ShapeDtypeStruct((M, two_c), x.dtype),
        grid_spec=pl.GridSpec(
            grid=grid,
            in_specs=[
                # One contiguous merged-parity block per tile (both row
                # parities in a single DMA).
                pl.BlockSpec((TR, 2, Wh, two_c), lambda i: (i, 0, 0, 0)),
                # Weights / LN params: grid-invariant, stay resident in VMEM.
                pl.BlockSpec((two_c, two_c), lambda i: (0, 0)),
                pl.BlockSpec((two_c, two_c), lambda i: (0, 0)),
                pl.BlockSpec((2, two_c), lambda i: (0, 0)),
            ],
            out_specs=pl.BlockSpec((tm, two_c), lambda i: (i, 0)),
        ),
        compiler_params=pltpu.CompilerParams(
            dimension_semantics=("parallel",),
            vmem_limit_bytes=vmem_limit,
        ),
    )(xr, wa, wb, params)

    return out.reshape(B, Hh * Wh, two_c)


def reference_forward(x, w_reduction, ln_gamma, ln_beta, input_resolution):
    """Pure-JAX reference matching the PyTorch module."""
    H, W = input_resolution
    B, L, C = x.shape
    xv = x.reshape(B, H, W, C)
    x0 = xv[:, 0::2, 0::2, :]
    x1 = xv[:, 1::2, 0::2, :]
    x2 = xv[:, 0::2, 1::2, :]
    x3 = xv[:, 1::2, 1::2, :]
    xm = jnp.concatenate([x0, x1, x2, x3], axis=-1).reshape(B, -1, 4 * C)
    y = jnp.einsum("blk,kn->bln", xm.astype(jnp.float32),
                   w_reduction.astype(jnp.float32))
    mean = jnp.mean(y, axis=-1, keepdims=True)
    var = jnp.mean((y - mean) ** 2, axis=-1, keepdims=True)
    yn = (y - mean) / jnp.sqrt(var + LN_EPS)
    return (yn * ln_gamma + ln_beta).astype(x.dtype)


if __name__ == "__main__":
    # Small shapes consistent with the module: B=2, H=W=16, dim=C=32.
    B, H, W, C = 2, 16, 16, 32
    key = jax.random.PRNGKey(0)
    kx, kw = jax.random.split(key)

    x = jax.random.normal(kx, (B, H * W, C), dtype=jnp.float32)

    # Deterministic synthetic parameters.
    # nn.Linear(4C, 2C, bias=False): torch weight is (2C, 4C); we store the
    # transposed (4C, 2C) matrix so the kernel computes x @ W directly.
    w_reduction = (jax.random.normal(kw, (4 * C, 2 * C), dtype=jnp.float32)
                   * (1.0 / jnp.sqrt(4.0 * C)))
    ln_gamma = jnp.ones((2 * C,), dtype=jnp.float32)
    ln_beta = jnp.zeros((2 * C,), dtype=jnp.float32)

    out = patch_merging_forward(x, w_reduction, ln_gamma, ln_beta, (H, W))
    out = jax.block_until_ready(out)

    ref = reference_forward(x, w_reduction, ln_gamma, ln_beta, (H, W))
    assert out.shape == (B, (H // 2) * (W // 2), 2 * C), out.shape
    assert jnp.allclose(out, ref, atol=1e-4, rtol=1e-4), "mismatch vs reference"

    print("KERNEL_OK")
</pallas_src>

<mosaic_0001>
module attributes {stable_mosaic.version = 11 : i64} {
  func.func @_patch_merge_kernel(%arg0: i32, %arg1: memref<4x2x8x64xf32, #tpu.memory_space<vmem>>, %arg2: memref<64x64xf32, #tpu.memory_space<vmem>>, %arg3: memref<64x64xf32, #tpu.memory_space<vmem>>, %arg4: memref<2x64xf32, #tpu.memory_space<vmem>>, %arg5: memref<32x64xf32, #tpu.memory_space<vmem>>) attributes {dimension_semantics = [#tpu.dimension_semantics<parallel>], iteration_bounds = array<i64: 4>, scalar_prefetch = 0 : i64, scratch_operands = 0 : i64, tpu.core_type = #tpu.core_type<tc>, window_params = [{transform_indices = @transform_0, window_bounds = array<i64: 4, 2, 8, 64>}, {pipeline_mode = #tpu.pipeline_mode<synchronous>, transform_indices = @transform_1, window_bounds = array<i64: 64, 64>}, {pipeline_mode = #tpu.pipeline_mode<synchronous>, transform_indices = @transform_2, window_bounds = array<i64: 64, 64>}, {pipeline_mode = #tpu.pipeline_mode<synchronous>, transform_indices = @transform_3, window_bounds = array<i64: 2, 64>}, {transform_indices = @transform_4, window_bounds = array<i64: 32, 64>}]} {
    %c0 = arith.constant 0 : index
    %c0_0 = arith.constant 0 : index
    %c0_1 = arith.constant 0 : index
    %c0_2 = arith.constant 0 : index
    %0 = vector.load %arg1[%c0, %c0_0, %c0_1, %c0_2] : memref<4x2x8x64xf32, #tpu.memory_space<vmem>>, vector<4x2x8x64xf32>
    %1 = vector.extract_strided_slice %0 {offsets = [0, 0, 0, 0], sizes = [4, 1, 8, 64], strides = [1, 1, 1, 1]} : vector<4x2x8x64xf32> to vector<4x1x8x64xf32>
    %2 = vector.shape_cast %1 : vector<4x1x8x64xf32> to vector<4x8x64xf32>
    %3 = vector.shape_cast %2 : vector<4x8x64xf32> to vector<32x64xf32>
    %4 = vector.extract_strided_slice %0 {offsets = [0, 1, 0, 0], sizes = [4, 1, 8, 64], strides = [1, 1, 1, 1]} : vector<4x2x8x64xf32> to vector<4x1x8x64xf32>
    %5 = vector.shape_cast %4 : vector<4x1x8x64xf32> to vector<4x8x64xf32>
    %6 = vector.shape_cast %5 : vector<4x8x64xf32> to vector<32x64xf32>
    %c0_3 = arith.constant 0 : index
    %c0_4 = arith.constant 0 : index
    %7 = vector.load %arg2[%c0_3, %c0_4] : memref<64x64xf32, #tpu.memory_space<vmem>>, vector<64x64xf32>
    %cst = arith.constant dense<0.000000e+00> : vector<32x64xf32>
    %8 = tpu.matmul %3, %7, %cst {dimension_numbers = #tpu.dot_dimension_numbers<[1], [0], [0], [1], [0, 0, 1, 1], [], []>} : vector<32x64xf32>, vector<64x64xf32>, vector<32x64xf32> -> vector<32x64xf32>
    %c0_5 = arith.constant 0 : index
    %c0_6 = arith.constant 0 : index
    %9 = vector.load %arg3[%c0_5, %c0_6] : memref<64x64xf32, #tpu.memory_space<vmem>>, vector<64x64xf32>
    %cst_7 = arith.constant dense<0.000000e+00> : vector<32x64xf32>
    %10 = tpu.matmul %6, %9, %cst_7 {dimension_numbers = #tpu.dot_dimension_numbers<[1], [0], [0], [1], [0, 0, 1, 1], [], []>} : vector<32x64xf32>, vector<64x64xf32>, vector<32x64xf32> -> vector<32x64xf32>
    %11 = arith.addf %8, %10 : vector<32x64xf32>
    %cst_8 = arith.constant dense<0.000000e+00> : vector<32xf32>
    %12 = vector.multi_reduction <add>, %11, %cst_8 [1] : vector<32x64xf32> to vector<32xf32>
    %13 = vector.shape_cast %12 : vector<32xf32> to vector<32x1xf32>
    %cst_9 = arith.constant 1.562500e-02 : f32
    %14 = vector.broadcast %cst_9 : f32 to vector<32x1xf32>
    %15 = arith.mulf %13, %14 : vector<32x1xf32>
    %16 = vector.broadcast %15 : vector<32x1xf32> to vector<32x64xf32>
    %17 = arith.subf %11, %16 : vector<32x64xf32>
    %18 = arith.mulf %17, %17 : vector<32x64xf32>
    %cst_10 = arith.constant dense<0.000000e+00> : vector<32xf32>
    %19 = vector.multi_reduction <add>, %18, %cst_10 [1] : vector<32x64xf32> to vector<32xf32>
    %20 = vector.shape_cast %19 : vector<32xf32> to vector<32x1xf32>
    %cst_11 = arith.constant 1.562500e-02 : f32
    %21 = vector.broadcast %cst_11 : f32 to vector<32x1xf32>
    %22 = arith.mulf %20, %21 : vector<32x1xf32>
    %cst_12 = arith.constant 9.99999974E-6 : f32
    %23 = vector.broadcast %cst_12 : f32 to vector<32x1xf32>
    %24 = arith.addf %22, %23 : vector<32x1xf32>
    %25 = math.rsqrt %24 : vector<32x1xf32>
    %26 = vector.broadcast %25 : vector<32x1xf32> to vector<32x64xf32>
    %27 = arith.mulf %17, %26 : vector<32x64xf32>
    %c0_13 = arith.constant 0 : index
    %c0_14 = arith.constant 0 : index
    %28 = vector.load %arg4[%c0_13, %c0_14] : memref<2x64xf32, #tpu.memory_space<vmem>>, vector<2x64xf32>
    %29 = vector.extract_strided_slice %28 {offsets = [0, 0], sizes = [1, 64], strides = [1, 1]} : vector<2x64xf32> to vector<1x64xf32>
    %30 = vector.extract_strided_slice %28 {offsets = [1, 0], sizes = [1, 64], strides = [1, 1]} : vector<2x64xf32> to vector<1x64xf32>
    %31 = vector.broadcast %29 : vector<1x64xf32> to vector<32x64xf32>
    %32 = arith.mulf %27, %31 : vector<32x64xf32>
    %33 = vector.broadcast %30 : vector<1x64xf32> to vector<32x64xf32>
    %34 = arith.addf %32, %33 : vector<32x64xf32>
    %c0_15 = arith.constant 0 : index
    %c0_16 = arith.constant 0 : index
    %35 = vector.load %arg5[%c0_15, %c0_16] : memref<32x64xf32, #tpu.memory_space<vmem>>, vector<32x64xf32>
    tpu.vector_store %arg5[%c0_15, %c0_16], %34 {strides = array<i32>} : memref<32x64xf32, #tpu.memory_space<vmem>>, vector<32x64xf32>,
    return
  }
  func.func @transform_0(%arg0: i32) -> (i32, i32, i32, i32) {
    %c0_i32 = arith.constant 0 : i32
    %c0_i32_0 = arith.constant 0 : i32
    %c0_i32_1 = arith.constant 0 : i32
    %c0_i32_2 = arith.constant 0 : i32
    return %arg0, %c0_i32, %c0_i32_0, %c0_i32_1 : i32, i32, i32, i32
  }
  func.func @transform_1(%arg0: i32) -> (i32, i32) {
    %c0_i32 = arith.constant 0 : i32
    %c0_i32_0 = arith.constant 0 : i32
    %c0_i32_1 = arith.constant 0 : i32
    return %c0_i32, %c0_i32_0 : i32, i32
  }
  func.func @transform_2(%arg0: i32) -> (i32, i32) {
    %c0_i32 = arith.constant 0 : i32
    %c0_i32_0 = arith.constant 0 : i32
    %c0_i32_1 = arith.constant 0 : i32
    return %c0_i32, %c0_i32_0 : i32, i32
  }
  func.func @transform_3(%arg0: i32) -> (i32, i32) {
    %c0_i32 = arith.constant 0 : i32
    %c0_i32_0 = arith.constant 0 : i32
    %c0_i32_1 = arith.constant 0 : i32
    return %c0_i32, %c0_i32_0 : i32, i32
  }
  func.func @transform_4(%arg0: i32) -> (i32, i32) {
    %c0_i32 = arith.constant 0 : i32
    %c0_i32_0 = arith.constant 0 : i32
    return %arg0, %c0_i32 : i32, i32
  }
}

</mosaic_0001>

<bundles_post_ra>
// kernel: tpu_custom_call.1
= control target key start
LH: loop header
LB: loop body
LE: loop exit
PB: predicated region body
PF: predicated region fallthrough
CT: control target
= control target key end

     0   :  { %9 = vsyncpa [#allocation3], 0  ;;  %s1126_s0 = inlined_call_operand.hbm [shape: f32[16,2,8,64], index: 0, kind: input, shape index: {}]   ;;  %s1127_s1 = inlined_call_operand.hbm [shape: f32[64,64], index: 1, kind: input, shape index: {}]   ;;  %s1128_s2 = inlined_call_operand.hbm [shape: f32[64,64], index: 2, kind: input, shape index: {}]   ;;  %s1129_s3 = inlined_call_operand.vmem [shape: f32[2,64], index: 3, kind: input, shape index: {}]   ;;  %s1130_s4 = inlined_call_operand.vmem [shape: f32[128,64], index: 4, kind: output, shape index: {}]  }
   0x1   :  { %11 = vsyncpa [#allocation3 + $0x1], 0 }
   0x2   :  { %12 = vsyncpa [#allocation5], 0  ;;  %s944_s15 = smov 0   ;;  %s946_s16 = smov 0  }
   0x3   :  { %s948_s17 = smov 0   ;;  %s950_s18 = smov 0  }
   0x4 LB: > { %s628_s19 = sadd.s32 4294967295, %s912_s18   ;;  %p38_p0 = scmp.ne.s32.totalorder %s904_s16, %s900_s15  ;;  %s912_s18 = sphi %s950_s18, %s1146_s18   ;;  %s908_s17 = sphi %s948_s17, %s1145_s17   ;;  %s904_s16 = sphi %s946_s16, %s1144_s16   ;;  %s900_s15 = sphi %s944_s15, %s1143_s15  }
   0x5   : > { %p966_p1 = scmp.eq.s32.totalorder %s628_s19, 0  ;;  %p630_p2 = scmp.ge.s32.totalorder %s912_s18, 1 }
   0x6   : > { %p138_p3 = scmp.lt.s32.totalorder %s912_s18, 5  ;;  %s914_s23 = smov [#allocation4]  }
   0x7   : > { %s1135_s20 = scalar_select %p966_p1, 1, 0 }
   0x8   : > { %p974_p4 = por %p966_p1, %p38_p0  ;;  %p978_p5 = pnand %p630_p2, %p138_p3 }
   0x9   : > { %s150_s24 = sshll.u32 %s914_s23, 4  ;;  %s915_s26 = smov [#allocation6]   ;;  %s151_s24 = int_to_ptr.vmem [resolvable:$true] %s150_s24 }
   0xa   : > { %s1136_s21 = scalar_select %p974_p4, 1, 0 }
   0xb   : > { %s1137_s22 = scalar_select %p978_p5, 1, 0 }
   0xc   : > { %p734_p6 = pneg %p978_p5  ;;  %s163_s27 = sshll.u32 %s915_s26, 4  ;;  %s164_s27 = int_to_ptr.vmem [resolvable:$true] %s163_s27 }
   0xd   : > { %s805_s28 = scalar_lea.vmem %s151_s24, 1024  ;;  %p813_p12 = scmp.lt.s32.totalorder %s151_s24, %s151_s24 }
   0xe   : > { %p986_p7 = pnand %p734_p6, %p966_p1  ;;  %p806_p9 = scmp.ne.s32.totalorder %s151_s24, %s805_s28 }
   0xf   : > { %p814_p13 = scmp.lt.s32.totalorder %s805_s28, %s805_s28 }
  0x10   : > { %p796_p8 = pneg %p986_p7 }
  0x11   : > { %p815_p0 = por %p814_p13, %p813_p12 }
  0x12   : > { %p808_p10 = pnand %p806_p9, %p796_p8 }
  0x14   : > { %p809_p11 = pneg %p808_p10 }
  0x16   : > { %p816_p2 = pnand %p815_p0, %p809_p11 }
  0x18   : > { %819 = shalt.err (!%p816_p2)
}
  0x19   : > { %s916_s29 = smov 128   ;;  %s917_s30 = smov 8  }
  0x1a   : > { %737 = dma.hbm_to_vmem [thread:$0]  (!%p986_p7), %s1127_s1, 1024, %s151_s24, [#allocation5], %s916_s29, %s916_s29, %s917_s30  }
  0x1b   : > { %s831_s7 = scalar_lea.vmem %s164_s27, 1024  ;;  %p839_p10 = scmp.lt.s32.totalorder %s164_s27, %s164_s27 }
  0x1c   : > { %p832_p3 = scmp.ne.s32.totalorder %s164_s27, %s831_s7  ;;  %p840_p11 = scmp.lt.s32.totalorder %s831_s7, %s831_s7 }
  0x1e   : > { %p834_p6 = pnand %p832_p3, %p796_p8  ;;  %p841_p12 = por %p840_p11, %p839_p10 }
  0x20   : > { %p835_p9 = pneg %p834_p6 }
  0x22   : > { %p842_p13 = pnand %p841_p12, %p835_p9 }
  0x24   : > { %845 = shalt.err (!%p842_p13)
}
  0x25   : > { %740 = dma.hbm_to_vmem [thread:$0]  (!%p986_p7), %s1128_s2, 1024, %s164_s27, [#allocation5], %s916_s29, %s916_s29, %s917_s30  }
  0x26   : > { %s1015_s10 = sadd.s32 1, %s912_s18   ;;  %s25_s11 = sadd.s32 1, %s908_s17 }
  0x27   : > { %s22_s12 = ssub.s32 %s912_s18, %s1015_s10  ;;  %p32_p8 = scmp.ne.s32.totalorder %s908_s17, %s904_s16 }
  0x28   : > { %p23_p0 = scmp.eq.s32.totalorder %s22_s12, 0  ;;  %p33_p2 = scmp.eq.s32.totalorder %s912_s18, 0 }
  0x29   : > { %p747_p3 = scmp.lt.s32.totalorder %s912_s18, 4  ;;  %s180_s13 = sand.u32 1, %s908_s17  }
  0x2a   : > { %s1026_s14 = scalar_select %p23_p0, %s908_s17, %s25_s11  }
  0x2b   : > { %p34_p6 = por %p33_p2, %p32_p8  ;;  %s634_s15 = sshll.u32 %s180_s13, 6 }
  0x2c   : > { %s655_s23 = sshll.u32 %s912_s18, 10  ;;  %s184_s27 = scalar_lea.vmem [#allocation2], %s634_s15 }
  0x2d   : > { %s1032_s26 = scalar_lea.hbm %s1126_s0, %s655_s23  ;;  %s192_s28 = sshll.u32 %s184_s27, 4  ;;  %s1038_s28 = int_to_ptr.vmem [resolvable:$true] %s192_s28 }
  0x2e   : > { %p1034_p7 = pnand %p747_p3, %p34_p6  ;;  %s1040_s6 = scalar_lea.sflag [#allocation3], %s180_s13 }
  0x2f   : > { %s846_s7 = scalar_lea.hbm %s1032_s26, 1024  ;;  %s851_s11 = scalar_lea.hbm %s1126_s0, 4096 }
  0x30   : > { %p847_p9 = scmp.ne.s32.totalorder %s1032_s26, %s846_s7  ;;  %p848_p10 = pneg %p1034_p7 }
  0x31   : > { %p852_p13 = scmp.lt.s32.totalorder %s1032_s26, %s1126_s0  ;;  %p853_p8 = scmp.lt.s32.totalorder %s851_s11, %s846_s7 }
  0x32   : > { %p849_p11 = pnand %p848_p10, %p847_p9 }
  0x33   : > { %p854_p0 = por %p853_p8, %p852_p13 }
  0x34   : > { %p850_p12 = pneg %p849_p11 }
  0x36   : > { %p855_p2 = pnand %p854_p0, %p850_p12 }
  0x38   : > { %858 = shalt.err (!%p855_p2)
}
  0x39   : > { %s859_s13 = scalar_lea.vmem %s1038_s28, 1024  ;;  %s918_s23 = smov [#allocation2]  }
  0x3a   : > { %p860_p3 = scmp.ne.s32.totalorder %s1038_s28, %s859_s13  ;;  %s864_s24 = sshll.u32 %s918_s23, 4  ;;  %s865_s24 = int_to_ptr.vmem [resolvable:$false] %s864_s24 }
  0x3b   : > { %s866_s25 = scalar_lea.vmem %s865_s24, 2048  ;;  %p867_p11 = scmp.lt.s32.totalorder %s1038_s28, %s865_s24 }
  0x3c   : > { %p862_p6 = pnand %p860_p3, %p848_p10  ;;  %p868_p1 = scmp.lt.s32.totalorder %s866_s25, %s859_s13 }
  0x3e   : > { %p863_p9 = pneg %p862_p6  ;;  %p869_p4 = por %p868_p1, %p867_p11 }
  0x40   : > { %p870_p5 = pnand %p869_p4, %p863_p9 }
  0x42   : > { %873 = shalt.err (!%p870_p5)
}
  0x43   : > { %744 = dma.hbm_to_vmem [thread:$0]  (!%p1034_p7), %s1032_s26, 1024, %s1038_s28, %s1040_s6, %s916_s29, %s916_s29, %s917_s30  }
  0x44   : > { %p1140_p10 = scmp.ne.s32.totalorder %s1137_s22, 0 }
  0x45   : > { %s206_s27 = sand.u32 (!%p1140_p10), 1, %s904_s16   ;;  %p1141_p1 = scmp.ne.s32.totalorder (!%p1140_p10), %s1136_s21, 0 }
  0x46   : > { %204 = sbr.rel (%p1140_p10) target bundleno = 612 (0x264), region = 36  ;;  %s639_s7 = sshll.u32 (!%p1140_p10), %s206_s27, 6 }
  0x47   : > { %s207_s8 = scalar_lea.sflag (!%p1140_p10), [#allocation3], %s206_s27  ;;  %s1067_s9 = scalar_lea.vmem (!%p1140_p10), [#allocation2], %s639_s7 }
  0x4b   : > { %891 = dma.done.wait (%p1141_p1), %s207_s8, 1024  }
  0x4c   : > { %893 = vsyncadd (%p1141_p1), %s207_s8, 4294966272  ;;  %p1142_p4 = scmp.ne.s32.totalorder %s1135_s20, 0 }
  0x4e   : > { %895 = dma.done.wait (%p1142_p4), [#allocation5], 2048  }
  0x4f   : > { %897 = vsyncadd (%p1142_p4), [#allocation5], 4294965248  ;;  %v273_v0 = vld [vmem:[#allocation6 + $0x38] sm:$0xff]  ;;  %v272_v2 = vld [vmem:[#allocation6 + $0x30] sm:$0xff]  ;;  %vm274_vm0 = vcmask 523264   ;;  %s642_s20 = sshll.u32 %s628_s19, 2 }
  0x50   : > { %v265_v1 = vld [vmem:[#allocation4 + $0x38] sm:$0xff]  ;;  %680 = vmatprep.subr.mxu0 %v273_v0  ;;  %v264_v3 = vld [vmem:[#allocation4 + $0x30] sm:$0xff]  ;;  %v271_v4 = vld [vmem:[#allocation6 + $0x28] sm:$0xff]  ;;  %p245_p5 = scmp.lt.s32.totalorder %s642_s20, 15 }
  0x51   : > { %702 = vmatprep.subr.mxu1 %v265_v1  ;;  %681 = vmatpush3.msra.mxu0 %v273_v0  ;;  %v263_v5 = vld [vmem:[#allocation4 + $0x28] sm:$0xff]  ;;  %v270_v6 = vld [vmem:[#allocation6 + $0x20] sm:$0xff]  ;;  %v269_v8 = vld [vmem:[#allocation6 + $0x18] sm:$0xff] }
  0x52   : > { %703 = vmatpush3.msra.mxu1 %v265_v1  ;;  %682 = vmatprep.subr.mxu0 %v272_v2  ;;  %v262_v7 = vld [vmem:[#allocation4 + $0x20] sm:$0xff]  ;;  %v261_v9 = vld [vmem:[#allocation4 + $0x18] sm:$0xff]  ;;  %v268_v10 = vld [vmem:[#allocation6 + $0x10] sm:$0xff]  ;;  %v522_v1 = vlaneseq  ;;  %s1148_s20 = smov (!%p245_p5, %s642_s20), 15 }
  0x53   : > { %704 = vmatprep.subr.mxu1 %v264_v3  ;;  %683 = vmatpush3.msra.mxu0 %v272_v2  ;;  %v260_v11 = vld [vmem:[#allocation4 + $0x10] sm:$0xff]  ;;  %v267_v12 = vld [vmem:[#allocation6 + $0x8] sm:$0xff]  ;;  %v266_v14 = vld [vmem:[#allocation6] sm:$0xff]  ;;  %s643_s29 = sshll.u32 %s1148_s20, 3 }
  0x54   : > { %705 = vmatpush3.msra.mxu1 %v264_v3  ;;  %684 = vmatprep.subr.mxu0 %v271_v4  ;;  %v259_v13 = vld [vmem:[#allocation4 + $0x8] sm:$0xff]  ;;  %v258_v15 = vld [vmem:[#allocation4] sm:$0xff]  ;;  %v253_v18 = vld [vmem:[%s1067_s9 + $0x18] sm:$0xff]  ;;  %s248_s30 = scalar_lea.vmem %s1130_s4, %s643_s29 }
  0x55   : > { %706 = vmatprep.subr.mxu1 %v263_v5  ;;  %685 = vmatpush3.msra.mxu0 %v271_v4  ;;  %v251_v16 = vld [vmem:[%s1067_s9 + $0x8] sm:$0xff]  ;;  %v250_v17 = vld [vmem:[%s1067_s9] sm:$0xff]  ;;  %v252_v19 = vld [vmem:[%s1067_s9 + $0x10] sm:$0xff] }
  0x56   : > { %707 = vmatpush3.msra.mxu1 %v263_v5  ;;  %686 = vmatprep.subr.mxu0 %v270_v6  ;;  %v255_v20 = vld [vmem:[%s1067_s9 + $0x28] sm:$0xff]  ;;  %v254_v21 = vld [vmem:[%s1067_s9 + $0x20] sm:$0xff]  ;;  %v257_v22 = vld [vmem:[%s1067_s9 + $0x38] sm:$0xff] }
  0x57   : > { %708 = vmatprep.subr.mxu1 %v262_v7  ;;  %687 = vmatpush3.msra.mxu0 %v270_v6  ;;  %v256_v23 = vld [vmem:[%s1067_s9 + $0x30] sm:$0xff] }
  0x58   : > { %709 = vmatpush3.msra.mxu1 %v262_v7  ;;  %688 = vmatprep.subr.mxu0 %v269_v8  ;;  %v523_v7 = vshrl.u32 %v522_v1, 7 }
  0x59   : > { %710 = vmatprep.subr.mxu1 %v261_v9  ;;  %689 = vmatpush3.msra.mxu0 %v269_v8 }
  0x5a   : > { %711 = vmatpush3.msra.mxu1 %v261_v9  ;;  %690 = vmatprep.subr.mxu0 %v268_v10 }
  0x5b   : > { %712 = vmatprep.subr.mxu1 %v260_v11  ;;  %691 = vmatpush3.msra.mxu0 %v268_v10  ;;  %v524_v10 = vsub.s32 0, %v523_v7 }
  0x5c   : > { %713 = vmatpush3.msra.mxu1 %v260_v11  ;;  %692 = vmatprep.subr.mxu0 %v267_v12  ;;  %v521_v11 = vld [vmem:[%s1129_s3] sm:$0x3] }
  0x5d   : > { %714 = vmatprep.subr.mxu1 %v259_v13  ;;  %693 = vmatpush3.msra.mxu0 %v267_v12  ;;  %v532_v12 = vsub.s32 1, %v523_v7 }
  0x5e   : > { %715 = vmatpush3.msra.mxu1 %v259_v13  ;;  %694 = vmatprep.subr.mxu0 %v266_v14  ;;  %v525_v13 = vrot.slane %v521_v11, %v524_v10 }
  0x5f   : > { %716 = vmatprep.subr.mxu1 %v258_v15  ;;  %695 = vmatpush3.msra.mxu0 %v266_v14 }
  0x60   : > { %696 = vmatprep.mubr.msk.f32.mxu0 %vm274_vm0, %v251_v16  ;;  %717 = vmatpush3.msra.mxu1 %v258_v15  ;;  %v533_v15 = vrot.slane %v521_v11, %v532_v12 }
  0x61   : > { %718 = vmatprep.mubr.msk.f32.mxu1 %vm274_vm0, %v250_v17  ;;  %697 = vmatmul.mubr.msk.f32.vlgmr.msra.gmra.mxu0 %vm274_vm0, %v253_v18 }
  0x62   : > { %719 = vmatmul.mubr.msk.f32.vlgmr.msra.gmra.mxu1 %vm274_vm0, %v252_v19  ;;  %699 = vmatprep.mubr.msk.f32.mxu0 %vm274_vm0, %v255_v20 }
  0x63   : > { %721 = vmatprep.mubr.msk.f32.mxu1 %vm274_vm0, %v254_v21 }
  0x65   : > { %700 = vmatmul.mubr.msk.f32.gmra.mxu0 %vm274_vm0, %v257_v22 }
  0x66   : > { %722 = vmatmul.mubr.msk.f32.gmra.mxu1 %vm274_vm0, %v256_v23 }
 0x121   : > { %v698_v24 = vpop.f32.mrf.mxu0 }
 0x122   : > { %v720_v25 = vpop.f32.mrf.mxu1 }
 0x123   : > { %v353_v26 = vpop.f32.mrf.mxu0  ;;  %v456_v31 = vadd.f32 %v720_v25, %v698_v24 }
 0x124   : > { %v450_v27 = vpop.f32.mrf.mxu1 }
 0x125   : > { %v451_v28 = vadd.f32 %v450_v27, %v353_v26  ;;  %v701_v29 = vpop.f32.mrf.mxu0  ;;  %v472_v38 = vsel %vm274_vm0, %v456_v31, 0.0 }
 0x126   : > { %v723_v30 = vpop.f32.mrf.mxu1 }
 0x127   : > { %v469_v32 = vsel %vm274_vm0, %v451_v28, 0.0  ;;  %v363_v33 = vpop.f32.mrf.mxu0  ;;  %v466_v36 = vadd.f32 %v723_v30, %v701_v29 }
 0x128   : > { %v460_v34 = vpop.f32.mrf.mxu1  ;;  %470 = vadd.xlane.f32.xlu0 %v469_v32 }
 0x129   : > { %v461_v35 = vadd.f32 %v460_v34, %v363_v33  ;;  %v478_v39 = vsel %vm274_vm0, %v466_v36, 0.0 }
 0x12b   : > { %v475_v37 = vsel %vm274_vm0, %v461_v35, 0.0 }
 0x12c   : > { %476 = vadd.xlane.f32.xlu1 %v475_v37  ;;  %473 = vadd.xlane.f32.xlu0 %v472_v38 }
 0x130   : > { %479 = vadd.xlane.f32.xlu1 %v478_v39 }
 0x1b1   : > { %v471_v40 = vpop.xlane.xlu0 %470 }
 0x1b2   : > { %v481_v41 = vmul.f32 0.015625, %v471_v40 }
 0x1b4   : > { %v485_v42 = vsub.f32 %v451_v28, %v481_v41 }
 0x1b5   : > { %v477_v43 = vpop.xlane.xlu1 %476  ;;  %v474_v44 = vpop.xlane.xlu0 %473 }
 0x1b6   : > { %v483_v45 = vmul.f32 0.015625, %v477_v43  ;;  %v482_v46 = vmul.f32 0.015625, %v474_v44  ;;  %v489_v47 = vmul.f32 %v485_v42, %v485_v42 }
 0x1b8   : > { %v487_v48 = vsub.f32 %v461_v35, %v483_v45  ;;  %v486_v49 = vsub.f32 %v456_v31, %v482_v46  ;;  %v493_v50 = vsel %vm274_vm0, %v489_v47, 0.0 }
 0x1b9   : > { %v480_v51 = vpop.xlane.xlu1 %479  ;;  %494 = vadd.xlane.f32.xlu0 %v493_v50 }
 0x1ba   : > { %v484_v52 = vmul.f32 0.015625, %v480_v51  ;;  %v491_v53 = vmul.f32 %v487_v48, %v487_v48  ;;  %v490_v54 = vmul.f32 %v486_v49, %v486_v49 }
 0x1bc   : > { %v488_v55 = vsub.f32 %v466_v36, %v484_v52  ;;  %v499_v56 = vsel %vm274_vm0, %v491_v53, 0.0  ;;  %v496_v57 = vsel %vm274_vm0, %v490_v54, 0.0 }
 0x1bd   : > { %500 = vadd.xlane.f32.xlu0 %v499_v56  ;;  %497 = vadd.xlane.f32.xlu1 %v496_v57 }
 0x1be   : > { %v492_v58 = vmul.f32 %v488_v55, %v488_v55 }
 0x1c0   : > { %v502_v59 = vsel %vm274_vm0, %v492_v58, 0.0 }
 0x1c1   : > { %503 = vadd.xlane.f32.xlu1 %v502_v59 }
 0x242   : > { %v495_v60 = vpop.xlane.xlu0 %494 }
 0x243   : > { %v505_v61 = vmul.f32 0.015625, %v495_v60 }
 0x245   : > { %v509_v62 = vadd.f32 1e-05, %v505_v61 }
 0x246   : > { %v498_v63 = vpop.xlane.xlu1 %497  ;;  %v501_v0 = vpop.xlane.xlu0 %500 }
 0x247   : > { %786 = vrsqrt.f32 %v509_v62  ;;  %v506_v2 = vmul.f32 0.015625, %v498_v63  ;;  %v507_v3 = vmul.f32 0.015625, %v501_v0 }
 0x249   : > { %v510_v4 = vadd.f32 1e-05, %v506_v2  ;;  %v511_v5 = vadd.f32 1e-05, %v507_v3 }
 0x24a   : > { %v504_v6 = vpop.xlane.xlu1 %503 }
 0x24b   : > { %788 = vrsqrt.f32 %v510_v4  ;;  %v508_v8 = vmul.f32 0.015625, %v504_v6 }
 0x24c   : > { %790 = vrsqrt.f32 %v511_v5 }
 0x24d   : > { %v512_v9 = vadd.f32 1e-05, %v508_v8 }
 0x24f   : > { %792 = vrsqrt.f32 %v512_v9 }
 0x254   : > { %v787_v14 = vpop.eup %786 }
 0x255   : > { %v517_v16 = vmul.f32 %v787_v14, %v485_v42 }
 0x257   : > { %v526_v17 = vmul.f32 %v525_v13, %v517_v16 }
 0x258   : > { %v789_v18 = vpop.eup %788 }
 0x259   : > { %v791_v19 = vpop.eup %790  ;;  %v534_v20 = vadd.f32 %v533_v15, %v526_v17  ;;  %v518_v21 = vmul.f32 %v789_v18, %v486_v49 }
 0x25a   : > { %v519_v22 = vmul.f32 %v791_v19, %v487_v48 }
 0x25b   : > { %538 = vst.msk [vmem:[%s248_s30] sm:$0xff] %vm274_vm0, %v534_v20  ;;  %v527_v23 = vmul.f32 %v525_v13, %v518_v21 }
 0x25c   : > { %v793_v24 = vpop.eup %792  ;;  %v528_v25 = vmul.f32 %v525_v13, %v519_v22 }
 0x25d   : > { %v535_v26 = vadd.f32 %v533_v15, %v527_v23  ;;  %v520_v27 = vmul.f32 %v793_v24, %v488_v55 }
 0x25e   : > { %v536_v28 = vadd.f32 %v533_v15, %v528_v25 }
 0x25f   : > { %539 = vst.msk [vmem:[%s248_s30 + $0x8] sm:$0xff] %vm274_vm0, %v535_v26  ;;  %v529_v29 = vmul.f32 %v525_v13, %v520_v27 }
 0x260   : > { %540 = vst.msk [vmem:[%s248_s30 + $0x10] sm:$0xff] %vm274_vm0, %v536_v28 }
 0x261   : > { %v537_v30 = vadd.f32 %v533_v15, %v529_v29 }
 0x263   : > { %541 = vst.msk [vmem:[%s248_s30 + $0x18] sm:$0xff] %vm274_vm0, %v537_v30 }
 0x264 PF: > { %p15_p7 = scmp.ge.s32.totalorder %s1015_s10, 6   ;;  %s1143_s15 = smov %s904_s16 }
 0x265   : > { %s1144_s16 = smov %s908_s17  ;;  %s1145_s17 = smov %s1026_s14 }
 0x266   : > { %s1146_s18 = smov %s1015_s10  ;;  %17 = sbr.rel (!%p15_p7) target bundleno = 4 (0x4), region = 84 }
 0x26b   :  { %564 = vsyncpa [#allocation3], 1 }
 0x26c   :  { %566 = vsyncpa [#allocation3 + $0x1], 1 }
 0x26d   :  { %567 = vsyncpa [#allocation5], 1 }

</bundles_post_ra>
